<compile_context>
chip_gen: v6e
topology: v6e:2x2x1
jax: 0.10.0
libtpu: 0.0.40
codegen_flags: <defaults>
</compile_context>

<pallas_src>
import functools

import jax
import jax.numpy as jnp
from jax import lax
from jax.experimental import pallas as pl
from jax.experimental.pallas import tpu as pltpu

_SUB, _LANE = 8, 128
_MIB = 1 << 20


def _device_kind():
    try:
        return jax.devices()[0].device_kind.lower()
    except Exception:
        return ""


def _vmem_budget_bytes():
    kind = _device_kind()
    if any(t in kind for t in ("v7", "7x", "tpu7")):
        return 48 * _MIB          # v7x: 64 MiB VMEM per TensorCore
    return 100 * _MIB             # v5e / v6e: 128 MiB parts


def _bf16_exp_supported():
    kind = _device_kind()
    if any(t in kind for t in ("v2", "v3", "v4", "v5")):
        return False              # v5e EUP has no bf16 path
    return any(t in kind for t in ("v6", "6 lite", "v7", "7x", "tpu7"))


def _vmem_est(n, d, tq):
    keys = n * d * 2                       # resident bf16 keys, single-buffered
    stream = 2 * 2 * tq * d * 2            # q + pos_k tiles, double-buffered
    slabs = 3 * tq * n * 4                 # live (tq, N) f32 intermediates
    return keys + stream + slabs + 2 * _MIB


def _pick_row_tile(n, d, budget):
    # Prefer 256/128 (512 buys no MXU efficiency on any generation and bloats
    # the (tq, N) slabs); require >= 2 grid steps so v7x's 2 TCs both get work;
    # shrink further if the VMEM estimate blows the per-generation budget.
    for t in (256, 128, 64, 32, 16, 8):
        if n % t == 0 and n // t >= 2:
            while t >= 16 and (n % (t // 2) == 0) and _vmem_est(n, d, t) > budget:
                t //= 2
            return t
    return n                               # tiny / odd N: single full tile


def _l2norm_kernel(x_ref, xn_ref, q_ref, *, inv_t):
    x = x_ref[...].astype(jnp.float32)
    ss = jnp.sum(x * x, axis=1, keepdims=True)
    # F.normalize(dim=1, eps=1e-12): x / max(||x||, 1e-12) == x * rsqrt(max(ss, 1e-24))
    xn = x * lax.rsqrt(jnp.maximum(ss, 1e-24))
    xn_ref[...] = xn.astype(xn_ref.dtype)
    # Pre-scaled query copy: folds 1/temperature into the MXU operand once.
    q_ref[...] = (xn * inv_t).astype(q_ref.dtype)


def _ntxent_kernel(q_ref, pk_ref, k_ref, out_ref, *,
                   inv_t, temperature, tq, n_rows, bf16_exp):
    i = pl.program_id(0)

    q = q_ref[...]                          # (tq, D) bf16, xn / temperature
    pk = pk_ref[...].astype(jnp.float32)    # (tq, D) positive key rows (unscaled xn)
    k = k_ref[...]                          # (N, D) bf16 resident keys

    # Scaled logit slab: S_t = (xn/t) @ xn.T — contract last dims (no transpose).
    s_t = lax.dot_general(q, k, (((1,), (1,)), ((), ())),
                          preferred_element_type=jnp.float32)       # (tq, N)

    qf = q.astype(jnp.float32)
    # Positive / diagonal logits via (tq, D) row-wise dots — no (tq, N) masked
    # reductions.  diag_row only feeds the neg statistic (loose precision need).
    pos_row = jnp.sum(qf * pk, axis=1, keepdims=True)               # scaled positive
    diag_row = jnp.sum(qf * qf, axis=1, keepdims=True) * temperature  # ~inv_t

    # Negatives statistic: full row sum minus diagonal minus positive.
    rowsum = jnp.sum(s_t, axis=1, keepdims=True)
    neg_row = rowsum - diag_row - pos_row

    # CrossEntropy with the positive as class 0 (n_views == 2):
    # per-row loss = logsumexp(off-diagonal scaled row) − positive logit.
    # Constant max shift m = inv_t (cosines <= 1); diagonal excluded exactly
    # with a large sentinel so exp underflows to 0.
    col = lax.broadcasted_iota(jnp.int32, (1, n_rows), 1)
    row = lax.broadcasted_iota(jnp.int32, (tq, 1), 0) + i * tq
    shifted = jnp.where(col == row, jnp.float32(-1e30), s_t) - inv_t
    if bf16_exp:
        ex = jnp.exp(shifted.astype(jnp.bfloat16))   # v6e/v7x: bf16 EUP ~2x
        expsum = jnp.sum(ex, axis=1, keepdims=True, dtype=jnp.float32)
    else:
        expsum = jnp.sum(jnp.exp(shifted), axis=1, keepdims=True)
    per_row = inv_t + jnp.log(expsum) - pos_row

    loss_sum = jnp.sum(per_row)
    pos_sum = jnp.sum(pos_row)
    neg_sum = jnp.sum(neg_row)

    # Lane-dense per-tile partials: sublane 0 -> loss, 1 -> pos, 2 -> neg.
    sub = lax.broadcasted_iota(jnp.int32, (1, _SUB, _LANE), 1)
    out_ref[...] = jnp.where(sub == 0, loss_sum,
                   jnp.where(sub == 1, pos_sum,
                   jnp.where(sub == 2, neg_sum, 0.0))).astype(jnp.float32)


def ntxent_pallas(features, batch_size, n_views=2, temperature=0.1):
    N, D = features.shape
    assert N == batch_size * n_views, "features must be (n_views*batch_size, D)"
    # TODO(synk): n_views > 2 needs the multi-positive CE logits layout of the
    # PyTorch module (only the first positive is the target); restrict to 2.
    assert n_views == 2, "kernel implements the n_views == 2 CE layout"

    inv_t = 1.0 / float(temperature)
    budget = _vmem_budget_bytes()
    tq = _pick_row_tile(N, D, budget)
    num_tiles = N // tq
    est = _vmem_est(N, D, tq)
    # TODO(synk): switch to key-tiled online logsumexp instead of failing here.
    assert est <= budget, (
        f"resident-key NTXent needs ~{est >> 20} MiB VMEM > budget {budget >> 20} MiB")

    # bf16 packs 16 rows per sublane tile; fall back to a single full block.
    ln_t = tq if (tq % 16 == 0) else N

    # 1) Row-tiled L2 normalization -> bf16 keys + pre-scaled bf16 queries.
    xn, q = pl.pallas_call(
        functools.partial(_l2norm_kernel, inv_t=inv_t),
        out_shape=(jax.ShapeDtypeStruct((N, D), jnp.bfloat16),
                   jax.ShapeDtypeStruct((N, D), jnp.bfloat16)),
        grid=(N // ln_t,),
        in_specs=[pl.BlockSpec((ln_t, D), lambda i: (i, 0))],
        out_specs=(pl.BlockSpec((ln_t, D), lambda i: (i, 0)),
                   pl.BlockSpec((ln_t, D), lambda i: (i, 0))),
        compiler_params=pltpu.CompilerParams(dimension_semantics=("parallel",)),
    )(features)

    # Positive key rows = the other view of the same sample (n_views == 2).
    pos_k = jnp.roll(xn, -batch_size, axis=0)

    kernel = functools.partial(
        _ntxent_kernel, inv_t=inv_t, temperature=float(temperature),
        tq=tq, n_rows=N, bf16_exp=_bf16_exp_supported())

    def _loss_call(single_buffer_keys):
        if single_buffer_keys:
            key_spec = pl.BlockSpec((N, D), lambda i: (0, 0),
                                    pipeline_mode=pl.Buffered(1))
        else:
            key_spec = pl.BlockSpec((N, D), lambda i: (0, 0))
        return pl.pallas_call(
            kernel,
            out_shape=jax.ShapeDtypeStruct((num_tiles, _SUB, _LANE), jnp.float32),
            grid=(num_tiles,),
            in_specs=[
                pl.BlockSpec((tq, D), lambda i: (i, 0)),   # pre-scaled query tile
                pl.BlockSpec((tq, D), lambda i: (i, 0)),   # positive key tile
                key_spec,                                  # resident full keys
            ],
            out_specs=pl.BlockSpec((1, _SUB, _LANE), lambda i: (i, 0, 0)),
            compiler_params=pltpu.CompilerParams(
                dimension_semantics=("parallel",),
                vmem_limit_bytes=int(budget)),
        )(q, pos_k, xn)

    try:
        partials = _loss_call(True)    # single-buffered constant-index keys
    except Exception:
        partials = _loss_call(False)   # fallback: default double buffering

    n_pos = float(N * (n_views - 1))
    n_neg = float(N * (N - n_views))
    loss = jnp.sum(partials[:, 0, 0]) / float(N)
    pos = jnp.sum(partials[:, 1, 0]) * temperature / n_pos   # undo 1/t folding
    neg = jnp.sum(partials[:, 2, 0]) * temperature / n_neg
    return loss, pos, neg


def ntxent_ref(features, batch_size, n_views=2, temperature=0.1):
    """Plain-JAX f32 reference mirroring the PyTorch module."""
    x = features.astype(jnp.float32)
    N = x.shape[0]
    xn = x / jnp.maximum(jnp.sqrt(jnp.sum(x * x, axis=1, keepdims=True)), 1e-12)
    S = xn @ xn.T
    labels = jnp.concatenate([jnp.arange(batch_size)] * n_views)
    lab = labels[None, :] == labels[:, None]
    diag = jnp.eye(N, dtype=bool)
    pos_mask = lab & ~diag
    neg_mask = ~lab
    pos = jnp.sum(jnp.where(pos_mask, S, 0.0)) / jnp.sum(pos_mask)
    neg = jnp.sum(jnp.where(neg_mask, S, 0.0)) / jnp.sum(neg_mask)
    S_t = S / temperature
    masked = jnp.where(diag, -jnp.inf, S_t)
    lse = jax.scipy.special.logsumexp(masked, axis=1)
    p = jnp.sum(jnp.where(pos_mask, S_t, 0.0), axis=1)
    loss = jnp.mean(lse - p)
    return loss, pos, neg


if __name__ == "__main__":
    batch_size = 4
    n_views = 2
    temperature = 0.1
    dim = 32

    key = jax.random.PRNGKey(0)
    # Rows 0..B-1 are view 0, rows B..2B-1 are view 1 (same ordering as torch.cat).
    features = jax.random.normal(key, (batch_size * n_views, dim), dtype=jnp.float32)

    loss, pos, neg = ntxent_pallas(features, batch_size, n_views, temperature)
    jax.block_until_ready((loss, pos, neg))

    loss_r, pos_r, neg_r = ntxent_ref(features, batch_size, n_views, temperature)
    # bf16 MXU operands (+ bf16 exp on v6e/v7x) introduce ~1e-3-level error in the
    # cosine sims; the CE loss amplifies that by 1/temperature, hence the looser
    # loss tolerance.
    assert jnp.allclose(loss, loss_r, rtol=2e-2, atol=2e-2), (loss, loss_r)
    assert jnp.allclose(pos, pos_r, rtol=5e-3, atol=5e-3), (pos, pos_r)
    assert jnp.allclose(neg, neg_r, rtol=5e-3, atol=5e-3), (neg, neg_r)

    print("KERNEL_OK")
</pallas_src>

<mosaic_0001>
module attributes {stable_mosaic.version = 11 : i64} {
  func.func @_l2norm_kernel(%arg0: i32, %arg1: memref<8x32xf32, #tpu.memory_space<vmem>>, %arg2: memref<8x32xbf16, #tpu.memory_space<vmem>>, %arg3: memref<8x32xbf16, #tpu.memory_space<vmem>>) attributes {dimension_semantics = [#tpu.dimension_semantics<parallel>], iteration_bounds = array<i64: 1>, scalar_prefetch = 0 : i64, scratch_operands = 0 : i64, tpu.core_type = #tpu.core_type<tc>, window_params = [{transform_indices = @transform_0, window_bounds = array<i64: 8, 32>}, {transform_indices = @transform_1, window_bounds = array<i64: 8, 32>}, {transform_indices = @transform_2, window_bounds = array<i64: 8, 32>}]} {
    %c0 = arith.constant 0 : index
    %c0_0 = arith.constant 0 : index
    %0 = vector.load %arg1[%c0, %c0_0] : memref<8x32xf32, #tpu.memory_space<vmem>>, vector<8x32xf32>
    %1 = arith.mulf %0, %0 : vector<8x32xf32>
    %cst = arith.constant dense<0.000000e+00> : vector<8xf32>
    %2 = vector.multi_reduction <add>, %1, %cst [1] : vector<8x32xf32> to vector<8xf32>
    %3 = vector.shape_cast %2 : vector<8xf32> to vector<8x1xf32>
    %cst_1 = arith.constant 1.000000e-24 : f32
    %4 = vector.broadcast %cst_1 : f32 to vector<8x1xf32>
    %5 = arith.maximumf %3, %4 : vector<8x1xf32>
    %6 = math.rsqrt %5 : vector<8x1xf32>
    %7 = vector.broadcast %6 : vector<8x1xf32> to vector<8x32xf32>
    %8 = arith.mulf %0, %7 : vector<8x32xf32>
    %9 = arith.truncf %8 : vector<8x32xf32> to vector<8x32xbf16>
    %c0_2 = arith.constant 0 : index
    %c0_3 = arith.constant 0 : index
    %10 = vector.load %arg2[%c0_2, %c0_3] : memref<8x32xbf16, #tpu.memory_space<vmem>>, vector<8x32xbf16>
    tpu.vector_store %arg2[%c0_2, %c0_3], %9 {strides = array<i32>} : memref<8x32xbf16, #tpu.memory_space<vmem>>, vector<8x32xbf16>,
    %cst_4 = arith.constant 1.000000e+01 : f32
    %11 = vector.broadcast %cst_4 : f32 to vector<8x32xf32>
    %12 = arith.mulf %8, %11 : vector<8x32xf32>
    %13 = arith.truncf %12 : vector<8x32xf32> to vector<8x32xbf16>
    %c0_5 = arith.constant 0 : index
    %c0_6 = arith.constant 0 : index
    %14 = vector.load %arg3[%c0_5, %c0_6] : memref<8x32xbf16, #tpu.memory_space<vmem>>, vector<8x32xbf16>
    tpu.vector_store %arg3[%c0_5, %c0_6], %13 {strides = array<i32>} : memref<8x32xbf16, #tpu.memory_space<vmem>>, vector<8x32xbf16>,
    return
  }
  func.func @transform_0(%arg0: i32) -> (i32, i32) {
    %c0_i32 = arith.constant 0 : i32
    %c0_i32_0 = arith.constant 0 : i32
    return %arg0, %c0_i32 : i32, i32
  }
  func.func @transform_1(%arg0: i32) -> (i32, i32) {
    %c0_i32 = arith.constant 0 : i32
    %c0_i32_0 = arith.constant 0 : i32
    return %arg0, %c0_i32 : i32, i32
  }
  func.func @transform_2(%arg0: i32) -> (i32, i32) {
    %c0_i32 = arith.constant 0 : i32
    %c0_i32_0 = arith.constant 0 : i32
    return %arg0, %c0_i32 : i32, i32
  }
}

</mosaic_0001>

<bundles_post_ra>
// kernel: tpu_custom_call.1
= control target key start
LH: loop header
LB: loop body
LE: loop exit
PB: predicated region body
PF: predicated region fallthrough
CT: control target
= control target key end

     0   :  { %8 = vsyncpa [#allocation3], 0  ;;  %s168_s0 = inlined_call_operand.hbm [shape: f32[8,32], index: 0, kind: input, shape index: {}]   ;;  %s169_s1 = inlined_call_operand.hbm [shape: bf16[8,32], index: 1, kind: output, shape index: {0}]   ;;  %s170_s2 = inlined_call_operand.hbm [shape: bf16[8,32], index: 2, kind: output, shape index: {1}]  }
   0x1   :  { %9 = vsyncpa [#allocation4], 0 }
   0x2   :  { %10 = vsyncpa [#allocation7], 0  ;;  %s139_s9 = smov [#allocation2]  }
   0x3   :  { %s17_s10 = sshll.u32 %s139_s9, 4  ;;  %s18_s10 = int_to_ptr.vmem [resolvable:$true] %s17_s10 }
   0x4   :  { %s81_s11 = scalar_lea.vmem %s18_s10, 128  ;;  %p86_p1 = scmp.lt.s32.totalorder %s18_s10, %s18_s10 }
   0x5   :  { %p82_p0 = scmp.ne.s32.totalorder %s18_s10, %s81_s11  ;;  %p87_p2 = scmp.lt.s32.totalorder %s81_s11, %s81_s11 }
   0x7   :  { %p88_p3 = por %p87_p2, %p86_p1 }
   0x9   :  { %p89_p4 = pnand %p88_p3, %p82_p0 }
   0xb   :  { %92 = shalt.err (!%p89_p4)
}
   0xc   :  { %20 = dma.hbm_to_vmem [thread:$0]  %s168_s0, 128, %s18_s10, [#allocation3]  }
   0xd   :  { %133 = dma.done.wait [#allocation3], 128  }
   0xe   :  { %134 = vsyncadd [#allocation3], 4294967168  ;;  %v24_v0 = vld [vmem:[#allocation2] sm:$0xff]  ;;  %vm26_vm0 = vcmask 261120   ;;  %s140_s14 = smov [#allocation5]   ;;  %vm34_vm1 = vcmask 257024  }
   0xf   :  { %v25_v1 = vmul.f32 %v24_v0, %v24_v0  ;;  %s45_s15 = sshll.u32 %s140_s14, 4  ;;  %s141_s16 = smov [#allocation6]   ;;  %s46_s15 = int_to_ptr.vmem [resolvable:$true] %s45_s15 }
  0x10   :  { %s55_s17 = sshll.u32 %s141_s16, 4  ;;  %s93_s0 = scalar_lea.vmem %s46_s15, 64  ;;  %s56_s17 = int_to_ptr.vmem [resolvable:$true] %s55_s17 }
  0x11   :  { %v27_v2 = vsel %vm26_vm0, %v25_v1, 0.0  ;;  %p94_p5 = scmp.ne.s32.totalorder %s46_s15, %s93_s0  ;;  %p98_p6 = scmp.lt.s32.totalorder %s46_s15, %s46_s15 }
  0x12   :  { %28 = vadd.xlane.f32.xlu0 %v27_v2  ;;  %p99_p7 = scmp.lt.s32.totalorder %s93_s0, %s93_s0 }
  0x14   :  { %p100_p8 = por %p99_p7, %p98_p6 }
  0x16   :  { %p101_p9 = pnand %p100_p8, %p94_p5 }
  0x9b   :  { %v29_v3 = vpop.xlane.xlu0 %28 }
  0x9c   :  { %v30_v4 = vmax.f32 %v29_v3, 1e-24 }
  0x9e   :  { %71 = vrsqrt.f32 %v30_v4 }
  0xab   :  { %v72_v5 = vpop.eup %71 }
  0xac   :  { %v32_v6 = vmul.f32 %v72_v5, %v24_v0 }
  0xae   :  { %v33_v7 = vpack.c.bf16 %v32_v6, %v32_v6  ;;  %v36_v8 = vmul.f32 10.0, %v32_v6 }
  0xb0   :  { %35 = vst.msk [vmem:[#allocation5] sm:$0xf] %vm34_vm1, %v33_v7  ;;  %v37_v9 = vpack.c.bf16 %v36_v8, %v36_v8 }
  0xb1   :  { %104 = shalt.err (!%p101_p9)
}
  0xb2   :  { %48 = dma.vmem_to_hbm [thread:$0]  %s46_s15, 64, %s169_s1, [#allocation4]   ;;  %38 = vst.msk [vmem:[#allocation6] sm:$0xf] %vm34_vm1, %v37_v9 }
  0xb3   :  { %s113_s20 = scalar_lea.vmem %s56_s17, 64  ;;  %p118_p11 = scmp.lt.s32.totalorder %s56_s17, %s56_s17 }
  0xb4   :  { %p114_p10 = scmp.ne.s32.totalorder %s56_s17, %s113_s20  ;;  %p119_p12 = scmp.lt.s32.totalorder %s113_s20, %s113_s20 }
  0xb6   :  { %p120_p13 = por %p119_p12, %p118_p11 }
  0xb8   :  { %p121_p0 = pnand %p120_p13, %p114_p10 }
  0xba   :  { %124 = shalt.err (!%p121_p0)
}
  0xbb   :  { %58 = dma.vmem_to_hbm [thread:$0]  %s56_s17, 64, %s170_s2, [#allocation7]  }
  0xbc   :  { %135 = dma.done.wait [#allocation4], 64  }
  0xbd   :  { %136 = vsyncadd [#allocation4], 4294967232 }
  0xbe   :  { %137 = dma.done.wait [#allocation7], 64  }
  0xbf   :  { %138 = vsyncadd [#allocation7], 4294967232 }
  0xc0   :  { %65 = vsyncpa [#allocation3], 1 }
  0xc1   :  { %66 = vsyncpa [#allocation4], 1 }
  0xc2   :  { %67 = vsyncpa [#allocation7], 1 }

</bundles_post_ra>
